<compile_context>
chip_gen: v7x
topology: tpu7x:2x2x1
jax: 0.10.0
libtpu: 0.0.40
codegen_flags: <defaults>
</compile_context>

<pallas_src>
import functools

import jax
import jax.numpy as jnp
import numpy as np
from jax.experimental import pallas as pl
from jax.experimental.pallas import tpu as pltpu


def _round_up(x, m):
    return ((x + m - 1) // m) * m


def _contrastive_kernel(feat_ref, idx_ref, ex_t_ref, out_ref, *,
                        n_rows, tile_n, num_examplars, inv_temp):
    feats = feat_ref[...]                                   # (TILE_N, D), native dtype
    ex_t = ex_t_ref[...]                                    # (D, E), native dtype

    # F.normalize(examplars, dim=1) folded into a post-matmul column scale:
    #   features @ (ex / max(||ex||, 1e-12)).T / temp
    #     == (features @ ex.T) * (inv_temp * rsqrt(max(sum(ex^2), 1e-24)))
    ex32 = ex_t.astype(jnp.float32)
    sumsq = jnp.sum(ex32 * ex32, axis=0, keepdims=True)     # (1, E)
    scale = jnp.float32(inv_temp) * jax.lax.rsqrt(
        jnp.maximum(sumsq, jnp.float32(1e-24)))             # (1, E), EUP rsqrt

    # Natural (M, K) x (K, N) MXU contraction with f32 accumulation.
    logits = jax.lax.dot_general(
        feats, ex_t, (((1,), (0,)), ((), ())),
        preferred_element_type=jnp.float32) * scale         # (TILE_N, E) f32

    # Numerically-stable log-softmax over the examplar axis.
    m = jnp.max(logits, axis=1, keepdims=True)
    shifted = logits - m
    lse = jnp.log(jnp.sum(jnp.exp(shifted), axis=1, keepdims=True))
    log_prob = shifted - lse                                 # (TILE_N, E)

    # One-hot gather at each row's action index, fused with the mask that drops
    # the out-of-range rows of the trailing partial tile.
    idx = idx_ref[...]                                       # (TILE_N, 1) int32
    cls = jax.lax.broadcasted_iota(jnp.int32, (1, num_examplars), 1)
    row = (pl.program_id(0) * tile_n
           + jax.lax.broadcasted_iota(jnp.int32, (tile_n, 1), 0))
    keep = jnp.logical_and(row < n_rows, idx == cls)         # (TILE_N, E)
    picked = jnp.where(keep, log_prob, jnp.float32(0.0))

    # Per-tile partial sum; the short tile axis is reduced outside the kernel.
    out_ref[...] = jnp.sum(picked).reshape(1, 1, 1)


def _vmem_capacity_bytes():
    cap = 64 << 20   # conservative default (v7x per-TensorCore VMEM)
    try:
        cap = int(getattr(pltpu.get_tpu_info(), "vmem_capacity_bytes", cap))
    except Exception:
        pass
    return cap


def _block_vmem_bytes(tile_n, dim, num_examplars, feat_bytes, ex_bytes):
    d_lane = _round_up(dim, 128)
    e_lane = _round_up(num_examplars, 128)
    d_sub = _round_up(dim, 8)
    feat_blk = 2 * tile_n * d_lane * feat_bytes              # double-buffered features
    idx_blk = 2 * tile_n * 128 * 4                           # (TILE_N, 1) int32, lane-padded
    ex_blk = 2 * d_sub * e_lane * ex_bytes                   # examplars (worst case 2 bufs)
    inter = 4 * tile_n * e_lane * 4                          # logits/shifted/exp/log_prob f32
    return feat_blk + idx_blk + ex_blk + inter


def _choose_tile_n(n_rows, dim, num_examplars, feat_bytes, ex_bytes, budget):
    d_lane = _round_up(dim, 128)
    e_lane = _round_up(num_examplars, 128)
    d_sub = _round_up(dim, 8)
    # Per-row VMEM: double-buffered feature/idx rows + f32 softmax intermediates.
    per_row = 2 * d_lane * feat_bytes + 2 * 128 * 4 + 4 * e_lane * 4
    fixed = 2 * d_sub * e_lane * ex_bytes                    # resident examplar block
    rows = (budget - fixed) // per_row if budget > fixed else 8
    # Keep >= 2 grid steps so the "parallel" axis can shard over both v7x cores.
    half_rows = _round_up(pl.cdiv(n_rows, 2), 8)
    return int(max(8, min(4096, half_rows, (rows // 8) * 8)))


def action_background_examplar_contrastive_loss(
        features, action_idxs, examplars, *, temp, base_temp,
        apply_action_wise_mean=False, tile_n=None):
    """Pallas implementation of ActionBackgroundExamplarContrastiveLoss.forward."""
    if apply_action_wise_mean:
        # TODO(synk): apply_action_wise_mean uses torch.nonzero + NaN-row
        # filtering (data-dependent output shapes); no static-shape Pallas
        # equivalent — compute the action-wise means upstream instead.
        raise NotImplementedError("apply_action_wise_mean=True is not supported")

    features = jnp.asarray(features)
    action_idxs = jnp.asarray(action_idxs, dtype=jnp.int32).reshape(-1, 1)
    examplars = jnp.asarray(examplars)

    n_rows, dim = features.shape
    num_examplars = examplars.shape[0]

    # Pre-transpose wrapper-side so the kernel feeds the MXU a (K, N) RHS, and
    # match dtypes so bf16 inputs stay on the native bf16 MXU path.
    examplars_t = examplars.T
    if examplars_t.dtype != features.dtype:
        examplars_t = examplars_t.astype(features.dtype)

    feat_bytes = features.dtype.itemsize
    ex_bytes = examplars_t.dtype.itemsize

    vmem_cap = _vmem_capacity_bytes()
    budget = max(4 << 20, min(vmem_cap // 4, 24 << 20))
    if tile_n is None:
        tile_n = _choose_tile_n(n_rows, dim, num_examplars,
                                feat_bytes, ex_bytes, budget)
    tile_n = max(8, _round_up(int(tile_n), 8))
    num_tiles = pl.cdiv(n_rows, tile_n)

    block_bytes = _block_vmem_bytes(tile_n, dim, num_examplars,
                                    feat_bytes, ex_bytes)
    vmem_limit = int(min(vmem_cap // 2, max(16 << 20, 2 * block_bytes)))

    kernel = functools.partial(
        _contrastive_kernel, n_rows=n_rows, tile_n=tile_n,
        num_examplars=num_examplars, inv_temp=float(1.0 / temp))

    cost = pl.CostEstimate(
        flops=(2 * n_rows * num_examplars * dim
               + 2 * num_tiles * num_examplars * dim        # per-tile norm sum-of-squares
               + 8 * n_rows * num_examplars),
        transcendentals=(n_rows * num_examplars + n_rows
                         + num_tiles * num_examplars),      # exp + log + rsqrt
        bytes_accessed=(n_rows * dim * feat_bytes
                        + num_tiles * num_examplars * dim * ex_bytes
                        + n_rows * 4 + num_tiles * 4))

    def _examplar_spec(single_buffer):
        if single_buffer:
            try:
                # Constant index_map: one resident buffer is enough; saves VMEM
                # (matters most on v7x's 64 MiB) and frees budget for tile_n.
                return pl.BlockSpec((dim, num_examplars), lambda i: (0, 0),
                                    pipeline_mode=pl.Buffered(1))
            except TypeError:
                return None
        return pl.BlockSpec((dim, num_examplars), lambda i: (0, 0))

    def _run(ex_spec):
        return pl.pallas_call(
            kernel,
            out_shape=jax.ShapeDtypeStruct((num_tiles, 1, 1), jnp.float32),
            grid=(num_tiles,),
            in_specs=[
                pl.BlockSpec((tile_n, dim), lambda i: (i, 0)),
                pl.BlockSpec((tile_n, 1), lambda i: (i, 0)),
                ex_spec,
            ],
            out_specs=pl.BlockSpec((1, 1, 1), lambda i: (i, 0, 0)),
            compiler_params=pltpu.CompilerParams(
                dimension_semantics=("parallel",),
                vmem_limit_bytes=vmem_limit),
            cost_estimate=cost,
        )(features, action_idxs, examplars_t)

    ex_spec = _examplar_spec(True)
    if ex_spec is None:
        partials = _run(_examplar_spec(False))
    else:
        try:
            partials = _run(ex_spec)
        except Exception:
            # Fall back to default double-buffering if this Pallas build rejects
            # single-buffered pipeline_mode; genuine kernel errors re-raise here.
            partials = _run(_examplar_spec(False))

    mean_log_prob = jnp.sum(partials) / jnp.float32(n_rows)
    # torch.isnan(...) print in the reference is a logging side effect only.
    return (-(temp / base_temp)) * mean_log_prob


def _reference_loss(features, action_idxs, examplars, *, temp, base_temp):
    """Plain-JAX reference mirroring the PyTorch forward (no action-wise mean)."""
    ex_n = examplars / jnp.maximum(
        jnp.linalg.norm(examplars, axis=1, keepdims=True), 1e-12)
    logits = (features @ ex_n.T) / temp
    logits = logits - jnp.max(logits, axis=1, keepdims=True)
    log_prob = logits - jnp.log(jnp.sum(jnp.exp(logits), axis=1, keepdims=True))
    mask = action_idxs[:, None] == jnp.arange(examplars.shape[0])[None, :]
    mean_log_prob = jnp.sum(jnp.where(mask, log_prob, 0.0), axis=1).mean()
    return -(temp / base_temp) * mean_log_prob


if __name__ == "__main__":
    N, D, E = 37, 32, 6              # action frames, feature dim, examplars
    temp, base_temp = 0.07, 0.07

    key = jax.random.PRNGKey(0)
    k_feat, k_idx, k_ex = jax.random.split(key, 3)
    features = jax.random.normal(k_feat, (N, D), dtype=jnp.float32)
    action_idxs = jax.random.randint(k_idx, (N,), 0, E, dtype=jnp.int32)
    examplars = jax.random.normal(k_ex, (E, D), dtype=jnp.float32)

    ref = _reference_loss(features, action_idxs, examplars,
                          temp=temp, base_temp=base_temp)

    # Auto-tiled path: VMEM-budgeted tile, >= 2 grid steps, masked partial tile.
    loss = action_background_examplar_contrastive_loss(
        features, action_idxs, examplars, temp=temp, base_temp=base_temp)
    loss = jax.block_until_ready(loss)
    np.testing.assert_allclose(np.asarray(loss), np.asarray(ref),
                               rtol=1e-5, atol=1e-5)

    # Explicit small tile: 3 grid steps incl. a masked partial tile (37 = 2*16 + 5).
    loss16 = action_background_examplar_contrastive_loss(
        features, action_idxs, examplars, temp=temp, base_temp=base_temp,
        tile_n=16)
    loss16 = jax.block_until_ready(loss16)
    np.testing.assert_allclose(np.asarray(loss16), np.asarray(ref),
                               rtol=1e-5, atol=1e-5)

    print("KERNEL_OK")
</pallas_src>

<mosaic_0001>
module attributes {stable_mosaic.version = 11 : i64} {
  func.func @_contrastive_kernel(%arg0: i32, %arg1: memref<24x32xf32, #tpu.memory_space<vmem>>, %arg2: memref<24x1xi32, #tpu.memory_space<vmem>>, %arg3: memref<32x6xf32, #tpu.memory_space<vmem>>, %arg4: memref<1x1x1xf32, #tpu.memory_space<vmem>>) attributes {dimension_semantics = [#tpu.dimension_semantics<parallel>], iteration_bounds = array<i64: 2>, scalar_prefetch = 0 : i64, scratch_operands = 0 : i64, tpu.core_type = #tpu.core_type<tc>, window_params = [{transform_indices = @transform_0, window_bounds = array<i64: 24, 32>}, {transform_indices = @transform_1, window_bounds = array<i64: 24, 1>}, {pipeline_mode = #tpu.pipeline_mode<synchronous>, transform_indices = @transform_2, window_bounds = array<i64: 32, 6>}, {transform_indices = @transform_3, window_bounds = array<i64: 1, 1, 1>}]} {
    %c0 = arith.constant 0 : index
    %c0_0 = arith.constant 0 : index
    %0 = vector.load %arg1[%c0, %c0_0] : memref<24x32xf32, #tpu.memory_space<vmem>>, vector<24x32xf32>
    %c0_1 = arith.constant 0 : index
    %c0_2 = arith.constant 0 : index
    %1 = vector.load %arg3[%c0_1, %c0_2] : memref<32x6xf32, #tpu.memory_space<vmem>>, vector<32x6xf32>
    %2 = arith.mulf %1, %1 : vector<32x6xf32>
    %cst = arith.constant dense<0.000000e+00> : vector<6xf32>
    %3 = vector.multi_reduction <add>, %2, %cst [0] : vector<32x6xf32> to vector<6xf32>
    %4 = vector.shape_cast %3 : vector<6xf32> to vector<1x6xf32>
    %cst_3 = arith.constant 1.000000e-24 : f32
    %5 = vector.broadcast %cst_3 : f32 to vector<1x6xf32>
    %6 = arith.maximumf %4, %5 : vector<1x6xf32>
    %7 = math.rsqrt %6 : vector<1x6xf32>
    %cst_4 = arith.constant 14.2857141 : f32
    %8 = vector.broadcast %cst_4 : f32 to vector<1x6xf32>
    %9 = arith.mulf %8, %7 : vector<1x6xf32>
    %cst_5 = arith.constant dense<0.000000e+00> : vector<24x6xf32>
    %10 = tpu.matmul %0, %1, %cst_5 {dimension_numbers = #tpu.dot_dimension_numbers<[1], [0], [0], [1], [0, 0, 1, 1], [], []>} : vector<24x32xf32>, vector<32x6xf32>, vector<24x6xf32> -> vector<24x6xf32>
    %11 = vector.broadcast %9 : vector<1x6xf32> to vector<24x6xf32>
    %12 = arith.mulf %10, %11 : vector<24x6xf32>
    %cst_6 = arith.constant dense<0xFF800000> : vector<24xf32>
    %13 = vector.multi_reduction <maximumf>, %12, %cst_6 [1] : vector<24x6xf32> to vector<24xf32>
    %14 = vector.shape_cast %13 : vector<24xf32> to vector<24x1xf32>
    %15 = vector.broadcast %14 : vector<24x1xf32> to vector<24x6xf32>
    %16 = arith.subf %12, %15 : vector<24x6xf32>
    %17 = math.exp %16 : vector<24x6xf32>
    %cst_7 = arith.constant dense<0.000000e+00> : vector<24xf32>
    %18 = vector.multi_reduction <add>, %17, %cst_7 [1] : vector<24x6xf32> to vector<24xf32>
    %19 = vector.shape_cast %18 : vector<24xf32> to vector<24x1xf32>
    %20 = math.log %19 : vector<24x1xf32>
    %21 = vector.broadcast %20 : vector<24x1xf32> to vector<24x6xf32>
    %22 = arith.subf %16, %21 : vector<24x6xf32>
    %c0_8 = arith.constant 0 : index
    %c0_9 = arith.constant 0 : index
    %23 = vector.load %arg2[%c0_8, %c0_9] : memref<24x1xi32, #tpu.memory_space<vmem>>, vector<24x1xi32>
    %24 = tpu.iota {dimensions = array<i32: 1>} : vector<1x6xi32>
    %c24_i32 = arith.constant 24 : i32
    %25 = arith.muli %arg0, %c24_i32 : i32
    %26 = tpu.iota {dimensions = array<i32: 0>} : vector<24x1xi32>
    %27 = vector.broadcast %25 : i32 to vector<24x1xi32>
    %28 = arith.addi %27, %26 : vector<24x1xi32>
    %c37_i32 = arith.constant 37 : i32
    %29 = vector.broadcast %c37_i32 : i32 to vector<24x1xi32>
    %30 = arith.cmpi slt, %28, %29 : vector<24x1xi32>
    %31 = vector.broadcast %23 : vector<24x1xi32> to vector<24x6xi32>
    %32 = vector.broadcast %24 : vector<1x6xi32> to vector<24x6xi32>
    %33 = arith.cmpi eq, %31, %32 : vector<24x6xi32>
    %34 = vector.broadcast %30 : vector<24x1xi1> to vector<24x6xi1>
    %35 = arith.andi %34, %33 : vector<24x6xi1>
    %cst_10 = arith.constant 0.000000e+00 : f32
    %36 = vector.broadcast %cst_10 : f32 to vector<24x6xf32>
    %37 = arith.select %35, %22, %36 : vector<24x6xi1>, vector<24x6xf32>
    %38 = vector.shape_cast %37 : vector<24x6xf32> to vector<1x24x6xf32>
    %cst_11 = arith.constant dense<0.000000e+00> : vector<1xf32>
    %39 = vector.multi_reduction <add>, %38, %cst_11 [1, 2] : vector<1x24x6xf32> to vector<1xf32>
    %40 = vector.shape_cast %39 : vector<1xf32> to vector<1x1x1xf32>
    %41 = vector.extract %40[0, 0, 0] : f32 from vector<1x1x1xf32>
    %42 = vector.broadcast %41 : f32 to vector<1x1x1xf32>
    %c0_12 = arith.constant 0 : index
    %c0_13 = arith.constant 0 : index
    %c0_14 = arith.constant 0 : index
    %43 = vector.load %arg4[%c0_12, %c0_13, %c0_14] : memref<1x1x1xf32, #tpu.memory_space<vmem>>, vector<1x1x1xf32>
    tpu.vector_store %arg4[%c0_12, %c0_13, %c0_14], %42 {strides = array<i32>} : memref<1x1x1xf32, #tpu.memory_space<vmem>>, vector<1x1x1xf32>,
    return
  }
  func.func @transform_0(%arg0: i32) -> (i32, i32) {
    %c0_i32 = arith.constant 0 : i32
    %c0_i32_0 = arith.constant 0 : i32
    return %arg0, %c0_i32 : i32, i32
  }
  func.func @transform_1(%arg0: i32) -> (i32, i32) {
    %c0_i32 = arith.constant 0 : i32
    %c0_i32_0 = arith.constant 0 : i32
    return %arg0, %c0_i32 : i32, i32
  }
  func.func @transform_2(%arg0: i32) -> (i32, i32) {
    %c0_i32 = arith.constant 0 : i32
    %c0_i32_0 = arith.constant 0 : i32
    %c0_i32_1 = arith.constant 0 : i32
    return %c0_i32, %c0_i32_0 : i32, i32
  }
  func.func @transform_3(%arg0: i32) -> (i32, i32, i32) {
    %c0_i32 = arith.constant 0 : i32
    %c0_i32_0 = arith.constant 0 : i32
    %c0_i32_1 = arith.constant 0 : i32
    return %arg0, %c0_i32, %c0_i32_0 : i32, i32, i32
  }
}

module attributes {stable_mosaic.version = 11 : i64} {
  func.func @_contrastive_kernel(%arg0: i32, %arg1: memref<24x32xf32, #tpu.memory_space<vmem>>, %arg2: memref<24x1xi32, #tpu.memory_space<vmem>>, %arg3: memref<32x6xf32, #tpu.memory_space<vmem>>, %arg4: memref<1x1x1xf32, #tpu.memory_space<vmem>>) attributes {dimension_semantics = [#tpu.dimension_semantics<parallel>], iteration_bounds = array<i64: 2>, scalar_prefetch = 0 : i64, scratch_operands = 0 : i64, tpu.core_type = #tpu.core_type<tc>, window_params = [{transform_indices = @transform_0, window_bounds = array<i64: 24, 32>}, {transform_indices = @transform_1, window_bounds = array<i64: 24, 1>}, {pipeline_mode = #tpu.pipeline_mode<synchronous>, transform_indices = @transform_2, window_bounds = array<i64: 32, 6>}, {transform_indices = @transform_3, window_bounds = array<i64: 1, 1, 1>}]} {
    %c0 = arith.constant 0 : index
    %c0_0 = arith.constant 0 : index
    %0 = vector.load %arg1[%c0, %c0_0] : memref<24x32xf32, #tpu.memory_space<vmem>>, vector<24x32xf32>
    %c0_1 = arith.constant 0 : index
    %c0_2 = arith.constant 0 : index
    %1 = vector.load %arg3[%c0_1, %c0_2] : memref<32x6xf32, #tpu.memory_space<vmem>>, vector<32x6xf32>
    %2 = arith.mulf %1, %1 : vector<32x6xf32>
    %cst = arith.constant dense<0.000000e+00> : vector<6xf32>
    %3 = vector.multi_reduction <add>, %2, %cst [0] : vector<32x6xf32> to vector<6xf32>
    %4 = vector.shape_cast %3 : vector<6xf32> to vector<1x6xf32>
    %cst_3 = arith.constant 1.000000e-24 : f32
    %5 = vector.broadcast %cst_3 : f32 to vector<1x6xf32>
    %6 = arith.maximumf %4, %5 : vector<1x6xf32>
    %7 = math.rsqrt %6 : vector<1x6xf32>
    %cst_4 = arith.constant 14.2857141 : f32
    %8 = vector.broadcast %cst_4 : f32 to vector<1x6xf32>
    %9 = arith.mulf %8, %7 : vector<1x6xf32>
    %cst_5 = arith.constant dense<0.000000e+00> : vector<24x6xf32>
    %10 = tpu.matmul %0, %1, %cst_5 {dimension_numbers = #tpu.dot_dimension_numbers<[1], [0], [0], [1], [0, 0, 1, 1], [], []>} : vector<24x32xf32>, vector<32x6xf32>, vector<24x6xf32> -> vector<24x6xf32>
    %11 = vector.broadcast %9 : vector<1x6xf32> to vector<24x6xf32>
    %12 = arith.mulf %10, %11 : vector<24x6xf32>
    %cst_6 = arith.constant dense<0xFF800000> : vector<24xf32>
    %13 = vector.multi_reduction <maximumf>, %12, %cst_6 [1] : vector<24x6xf32> to vector<24xf32>
    %14 = vector.shape_cast %13 : vector<24xf32> to vector<24x1xf32>
    %15 = vector.broadcast %14 : vector<24x1xf32> to vector<24x6xf32>
    %16 = arith.subf %12, %15 : vector<24x6xf32>
    %17 = math.exp %16 : vector<24x6xf32>
    %cst_7 = arith.constant dense<0.000000e+00> : vector<24xf32>
    %18 = vector.multi_reduction <add>, %17, %cst_7 [1] : vector<24x6xf32> to vector<24xf32>
    %19 = vector.shape_cast %18 : vector<24xf32> to vector<24x1xf32>
    %20 = math.log %19 : vector<24x1xf32>
    %21 = vector.broadcast %20 : vector<24x1xf32> to vector<24x6xf32>
    %22 = arith.subf %16, %21 : vector<24x6xf32>
    %c0_8 = arith.constant 0 : index
    %c0_9 = arith.constant 0 : index
    %23 = vector.load %arg2[%c0_8, %c0_9] : memref<24x1xi32, #tpu.memory_space<vmem>>, vector<24x1xi32>
    %24 = tpu.iota {dimensions = array<i32: 1>} : vector<1x6xi32>
    %c24_i32 = arith.constant 24 : i32
    %25 = arith.muli %arg0, %c24_i32 : i32
    %26 = tpu.iota {dimensions = array<i32: 0>} : vector<24x1xi32>
    %27 = vector.broadcast %25 : i32 to vector<24x1xi32>
    %28 = arith.addi %27, %26 : vector<24x1xi32>
    %c37_i32 = arith.constant 37 : i32
    %29 = vector.broadcast %c37_i32 : i32 to vector<24x1xi32>
    %30 = arith.cmpi slt, %28, %29 : vector<24x1xi32>
    %31 = vector.broadcast %23 : vector<24x1xi32> to vector<24x6xi32>
    %32 = vector.broadcast %24 : vector<1x6xi32> to vector<24x6xi32>
    %33 = arith.cmpi eq, %31, %32 : vector<24x6xi32>
    %34 = vector.broadcast %30 : vector<24x1xi1> to vector<24x6xi1>
    %35 = arith.andi %34, %33 : vector<24x6xi1>
    %cst_10 = arith.constant 0.000000e+00 : f32
    %36 = vector.broadcast %cst_10 : f32 to vector<24x6xf32>
    %37 = arith.select %35, %22, %36 : vector<24x6xi1>, vector<24x6xf32>
    %38 = vector.shape_cast %37 : vector<24x6xf32> to vector<1x24x6xf32>
    %cst_11 = arith.constant dense<0.000000e+00> : vector<1xf32>
    %39 = vector.multi_reduction <add>, %38, %cst_11 [1, 2] : vector<1x24x6xf32> to vector<1xf32>
    %40 = vector.shape_cast %39 : vector<1xf32> to vector<1x1x1xf32>
    %41 = vector.extract %40[0, 0, 0] : f32 from vector<1x1x1xf32>
    %42 = vector.broadcast %41 : f32 to vector<1x1x1xf32>
    %c0_12 = arith.constant 0 : index
    %c0_13 = arith.constant 0 : index
    %c0_14 = arith.constant 0 : index
    %43 = vector.load %arg4[%c0_12, %c0_13, %c0_14] : memref<1x1x1xf32, #tpu.memory_space<vmem>>, vector<1x1x1xf32>
    tpu.vector_store %arg4[%c0_12, %c0_13, %c0_14], %42 {strides = array<i32>} : memref<1x1x1xf32, #tpu.memory_space<vmem>>, vector<1x1x1xf32>,
    return
  }
  func.func @transform_0(%arg0: i32) -> (i32, i32) {
    %c0_i32 = arith.constant 0 : i32
    %c0_i32_0 = arith.constant 0 : i32
    return %arg0, %c0_i32 : i32, i32
  }
  func.func @transform_1(%arg0: i32) -> (i32, i32) {
    %c0_i32 = arith.constant 0 : i32
    %c0_i32_0 = arith.constant 0 : i32
    return %arg0, %c0_i32 : i32, i32
  }
  func.func @transform_2(%arg0: i32) -> (i32, i32) {
    %c0_i32 = arith.constant 0 : i32
    %c0_i32_0 = arith.constant 0 : i32
    %c0_i32_1 = arith.constant 0 : i32
    return %c0_i32, %c0_i32_0 : i32, i32
  }
  func.func @transform_3(%arg0: i32) -> (i32, i32, i32) {
    %c0_i32 = arith.constant 0 : i32
    %c0_i32_0 = arith.constant 0 : i32
    %c0_i32_1 = arith.constant 0 : i32
    return %arg0, %c0_i32, %c0_i32_0 : i32, i32, i32
  }
}

</mosaic_0001>

<bundles_post_ra>
// kernel: tpu_custom_call.1
= control target key start
LH: loop header
LB: loop body
LE: loop exit
PB: predicated region body
PF: predicated region fallthrough
CT: control target
= control target key end

     0   :  { %s613_s12 = smov 0   ;;  %s674_s0 = inlined_call_operand.vmem [shape: f32[37,32], index: 0, kind: input, shape index: {}]   ;;  %s675_s1 = inlined_call_operand.vmem [shape: s32[37,1], index: 1, kind: input, shape index: {}]   ;;  %s676_s2 = inlined_call_operand.vmem [shape: f32[32,6], index: 2, kind: input, shape index: {}]   ;;  %s677_s3 = inlined_call_operand.vmem [shape: f32[2,1,1], index: 3, kind: output, shape index: {}]  }
   0x1 LB: > { %s619_s13 = sadd.s32 4294967295, %s587_s12   ;;  %p509_p0 = scmp.ge.s32.totalorder %s587_s12, 1  ;;  %s587_s12 = sphi %s613_s12, %s13_s12  }
   0x2   : > { %p165_p1 = scmp.lt.s32.totalorder %s587_s12, 3 }
   0x4   : > { %p166_p2 = pnand %p509_p0, %p165_p1 }
   0x5   : > { %v234_v0 = vld [vmem:[%s676_s2] sm:$0xff] (!%p166_p2)  ;;  %v235_v1 = vld [vmem:[%s676_s2 + $0x8] sm:$0xff] (!%p166_p2)  ;;  %vm242_vm0 = vcmask (!%p166_p2), 48128   ;;  %v236_v2 = vld [vmem:[%s676_s2 + $0x10] sm:$0xff] (!%p166_p2)  ;;  %v589_v3 = vmov (!%p166_p2), 0.0|0.0   ;;  %s200_s22 = smul.u32 (!%p166_p2), 3, %s619_s13 }
   0x6   : > { %169 = sbr.rel (%p166_p2) target bundleno = 810 (0x32a), region = 32  ;;  %541 = vmatprep.subr.bf16.mxu0 (!%p166_p2), %v589_v3  ;;  %547 = vmatprep.subr.bf16.mxu1 (!%p166_p2), %v589_v3  ;;  %v238_v4 = vmul.f32 (!%p166_p2), %v234_v0, %v234_v0  ;;  %v239_v5 = vmul.f32 (!%p166_p2), %v235_v1, %v235_v1  ;;  %v542_v6 = vpack.c.bf16 (!%p166_p2), %v235_v1, %v234_v0  ;;  %v237_v7 = vld [vmem:[%s676_s2 + $0x18] sm:$0xff] (!%p166_p2)  ;;  %vm590_vm1 = vmmov (!%p166_p2), 0   ;;  %p228_p4 = scmp.lt.s32.totalorder (!%p166_p2), %s619_s13, 1 }
   0x7   : > { %v240_v8 = vmul.f32 (!%p166_p2), %v236_v2, %v236_v2  ;;  %v241_v9 = vmul.f32 (!%p166_p2), %v237_v7, %v237_v7  ;;  %v591_v10 = vmov (!%p166_p2), 0.0   ;;  %v545_v13 = vpack.c.bf16 (!%p166_p2), %v237_v7, %v236_v2  ;;  %p205_p3 = scmp.lt.s32.totalorder (!%p166_p2), %s200_s22, 4  ;;  %s393_s30 = smul.u32 (!%p166_p2), 24, %s619_s13 }
   0x8   : > { %532 = vmatprep.mubr.msk.f32.mxu0 (!%p166_p2), %vm590_vm1, %v591_v10  ;;  %535 = vmatprep.mubr.msk.f32.mxu1 (!%p166_p2), %vm590_vm1, %v591_v10  ;;  %v243_v11 = vsel (!%p166_p2), %vm242_vm0, %v238_v4, 0.0  ;;  %v244_v12 = vsel (!%p166_p2), %vm242_vm0, %v239_v5, 0.0  ;;  %vm259_vm2 = vcmask (!%p166_p2), 261120   ;;  %v592_v43 = vmov (!%p166_p2), 0  }
   0x9   : > { %543 = vmatpush3.bf16.msra.mxu0 (!%p166_p2), %v542_v6  ;;  %549 = vmatpush3.bf16.msra.mxu1 (!%p166_p2), %v542_v6  ;;  %v245_v14 = vadd.f32 (!%p166_p2), %v244_v12, %v243_v11  ;;  %v246_v15 = vsel (!%p166_p2), %vm242_vm0, %v240_v8, 0.0  ;;  %v248_v16 = vsel (!%p166_p2), %vm242_vm0, %v241_v9, 0.0  ;;  %v391_v0 = vlaneseq (!%p166_p2) }
   0xa   : > { %544 = vmatprep.subr.bf16.mxu0 (!%p166_p2), %v589_v3  ;;  %548 = vmatprep.subr.bf16.mxu1 (!%p166_p2), %v589_v3  ;;  %v398_v4 = vstv (!%p166_p2), %s393_s30  ;;  %vm444_vm12 = vcmask (!%p166_p2), 0  }
   0xb   : > { %v247_v17 = vadd.f32 (!%p166_p2), %v246_v15, %v245_v14  ;;  %566 = vset.pattern.permute.xlu1 (!%p166_p2), %v592_v43  ;;  %565 = vset.pattern.permute.xlu0 (!%p166_p2), %v592_v43  ;;  %v395_v1 = vshrl.u32 (!%p166_p2), %v391_v0, 7  ;;  %v392_v8 = vand.u32 (!%p166_p2), 127, %v391_v0 }
   0xd   : > { %s679_s22 = smov (!%p205_p3, %s200_s22), 4  ;;  %546 = vmatpush3.bf16.msra.mxu0 %v545_v13  ;;  %550 = vmatpush3.bf16.msra.mxu1 %v545_v13  ;;  %v249_v18 = vadd.f32 %v248_v16, %v247_v17  ;;  %v396_v3 = vadd.s32 8, %v395_v1  ;;  %v399_v11 = vadd.s32 %v398_v4, %v395_v1  ;;  %v397_v14 = vadd.s32 16, %v395_v1  ;;  %s681_s13 = smov (!%p228_p4, %s619_s13), 1 }
   0xe   : > { %s510_s23 = sshll.u32 %s679_s22, 3  ;;  %s230_s6 = scalar_lea.vmem %s677_s3, %s681_s13 }
   0xf   : > { %s208_s26 = scalar_lea.vmem %s674_s0, %s510_s23  ;;  %v250_v22 = vrot.slane %v249_v18, 4  ;;  %s222_s29 = scalar_lea.vmem %s675_s1, %s510_s23  ;;  %v400_v9 = vadd.s32 %v398_v4, %v396_v3  ;;  %vm402_vm5 = vcmp.lt.s32.totalorder %v399_v11, 37  ;;  %v401_v17 = vadd.s32 %v398_v4, %v397_v14 }
  0x10   : > { %v231_v19 = vld [vmem:[%s208_s26] sm:$0xff]  ;;  %v232_v20 = vld [vmem:[%s208_s26 + $0x8] sm:$0xff]  ;;  %v233_v21 = vld [vmem:[%s208_s26 + $0x10] sm:$0xff] }
  0x11   : > { %533 = vmatmul.mubr.msk.f32.vlgmr.msra.gmra.mrb[0].mxu0 %vm259_vm2, %v231_v19  ;;  %536 = vmatmul.mubr.msk.f32.vlgmr.msra.gmra.mrb[0].mxu1 %vm259_vm2, %v232_v20  ;;  %v251_v23 = vadd.f32 %v250_v22, %v249_v18  ;;  %v389_v54 = vld [vmem:[%s222_s29 + $0x8] sm:$0xff]  ;;  %v388_v55 = vld [vmem:[%s222_s29] sm:$0xff]  ;;  %v390_v61 = vld [vmem:[%s222_s29 + $0x10] sm:$0xff]  ;;  %vm403_vm3 = vcmp.lt.s32.totalorder %v400_v9, 37  ;;  %vm404_vm9 = vcmp.lt.s32.totalorder %v401_v17, 37 }
  0x12   : > { %538 = vmatprep.mubr.msk.f32.mxu1 %vm590_vm1, %v591_v10 }
  0x13   : > { %v252_v24 = vrot.slane %v251_v23, 2 }
  0x15   : > { %539 = vmatmul.mubr.msk.f32.gmra.mrb[2].mxu1 %vm259_vm2, %v233_v21  ;;  %v253_v25 = vadd.f32 %v252_v24, %v251_v23 }
  0x17   : > { %v254_v26 = vrot.slane %v253_v25, 1 }
  0x19   : > { %v255_v27 = vadd.f32 %v254_v26, %v253_v25 }
  0x1b   : > { %v256_v28 = vmax.f32 %v255_v27, 1e-24 }
  0x1d   : > { %567 = vrsqrt.f32 %v256_v28 }
  0x27   : > { %v568_v29 = vpop.eup %567 }
  0x28   : > { %v258_v30 = vmul.f32 14.285714, %v568_v29 }
  0xe4   : > { %v335_v31 = vpop.f32.mrb[0].mxu0  ;;  %v340_v32 = vpop.f32.mrb[0].mxu1 }
  0xe5   : > { %v349_v33 = vmul.f32 %v335_v31, %v258_v30  ;;  %v534_v34 = vpop.f32.mrb[1].mxu0  ;;  %v350_v35 = vmul.f32 %v340_v32, %v258_v30  ;;  %v537_v36 = vpop.f32.mrb[1].mxu1 }
  0xe7   : > { %v352_v37 = vsel %vm242_vm0, %v349_v33, -inf  ;;  %v355_v40 = vsel %vm242_vm0, %v350_v35, -inf }
  0xe8   : > { %v345_v38 = vpop.f32.mrb[2].mxu1  ;;  %353 = vmax.xlane.f32.xlu0 %v352_v37 }
  0xe9   : > { %v351_v39 = vmul.f32 %v345_v38, %v258_v30  ;;  %v540_v41 = vpop.f32.mrb[3].mxu1 }
  0xeb   : > { %v358_v42 = vsel %vm242_vm0, %v351_v39, -inf }
  0xec   : > { %359 = vmax.xlane.f32.xlu1 %v358_v42  ;;  %356 = vmax.xlane.f32.xlu0 %v355_v40 }
 0x175   : > { %v354_v44 = vpop.xlane.xlu0 %353 }
 0x176   : > { %v361_v45 = vsub.f32 %v349_v33, %v354_v44 }
 0x178   : > { %v364_v46 = vmul.f32 1.442695, %v361_v45 }
 0x179   : > { %v357_v47 = vpop.xlane.xlu0 %356  ;;  %v360_v56 = vpop.xlane.xlu1 %359 }
 0x17a   : > { %569 = vpow2.f32 %v364_v46  ;;  %v362_v48 = vsub.f32 %v350_v35, %v357_v47  ;;  %v363_v57 = vsub.f32 %v351_v39, %v360_v56 }
 0x17c   : > { %v366_v49 = vmul.f32 1.442695, %v362_v48  ;;  %v368_v58 = vmul.f32 1.442695, %v363_v57 }
 0x17e   : > { %571 = vpow2.f32 %v366_v49 }
 0x17f   : > { %573 = vpow2.f32 %v368_v58 }
 0x184   : > { %v570_v50 = vpop.eup %569 }
 0x185   : > { %v370_v51 = vsel %vm242_vm0, %v570_v50, 0.0 }
 0x186   : > { %371 = vadd.xlane.f32.xlu1 %v370_v51 }
 0x188   : > { %v572_v52 = vpop.eup %571 }
 0x189   : > { %v373_v53 = vsel %vm242_vm0, %v572_v52, 0.0  ;;  %v574_v59 = vpop.eup %573 }
 0x18a   : > { %374 = vadd.xlane.f32.xlu0 %v373_v53  ;;  %v376_v60 = vsel %vm242_vm0, %v574_v59, 0.0 }
 0x197   : > { %409 = vperm.xlu1 %566, %v389_v54  }
 0x1a0   : > { %406 = vperm.xlu0 %565, %v388_v55  }
 0x1bb   : > { %377 = vadd.xlane.f32.xlu1 %v376_v60 }
 0x1cc   : > { %412 = vperm.xlu1 %566, %v390_v61  }
 0x213   : > { %v372_v63 = vpop.xlane.xlu1 %371 }
 0x217   : > { %v375_v62 = vpop.xlane.xlu0 %374  ;;  %v410_v2 = vpop.permute.xlu1 %409 }
 0x218   : > { %575 = vlog2.f32 %v375_v62  ;;  %vm415_vm4 = vcmp.eq.s32.totalorder %v410_v2, %v392_v8 }
 0x219   : > { %577 = vlog2.f32 %v372_v63  ;;  %vm424_vm7 = vmand %vm403_vm3, %vm415_vm4 }
 0x21f   : > { %v407_v12 = vpop.permute.xlu0 %406 }
 0x220   : > { %vm414_vm6 = vcmp.eq.s32.totalorder %v407_v12, %v392_v8 }
 0x221   : > { %vm423_vm8 = vmand %vm402_vm5, %vm414_vm6 }
 0x222   : > { %v576_v5 = vpop.eup %575 }
 0x223   : > { %v578_v7 = vpop.eup %577  ;;  %v382_v10 = vmul.f32 0.6931472, %v576_v5 }
 0x224   : > { %v380_v13 = vmul.f32 0.6931472, %v578_v7 }
 0x225   : > { %v386_v15 = vsub.f32 %v362_v48, %v382_v10 }
 0x226   : > { %v385_v16 = vsub.f32 %v361_v45, %v380_v13 }
 0x227   : > { %v427_v19 = vsel %vm424_vm7, %v386_v15, 0.0 }
 0x228   : > { %v426_v21 = vsel %vm423_vm8, %v385_v16, 0.0  ;;  %v430_v23 = vsel %vm242_vm0, %v427_v19, 0.0 }
 0x229   : > { %v429_v25 = vsel %vm242_vm0, %v426_v21, 0.0 }
 0x22a   : > { %v431_v27 = vadd.f32 %v430_v23, %v429_v25 }
 0x248   : > { %v378_v6 = vpop.xlane.xlu1 %377 }
 0x249   : > { %579 = vlog2.f32 %v378_v6 }
 0x24c   : > { %v413_v18 = vpop.permute.xlu1 %412 }
 0x24d   : > { %vm416_vm10 = vcmp.eq.s32.totalorder %v413_v18, %v392_v8 }
 0x24e   : > { %vm425_vm11 = vmand %vm404_vm9, %vm416_vm10 }
 0x253   : > { %v580_v20 = vpop.eup %579 }
 0x254   : > { %v384_v22 = vmul.f32 0.6931472, %v580_v20 }
 0x256   : > { %v387_v24 = vsub.f32 %v363_v57, %v384_v22 }
 0x258   : > { %v428_v26 = vsel %vm425_vm11, %v387_v24, 0.0 }
 0x259   : > { %v432_v28 = vsel %vm242_vm0, %v428_v26, 0.0 }
 0x25a   : > { %v433_v29 = vadd.f32 %v432_v28, %v431_v27 }
 0x25c   : > { %434 = vadd.xlane.f32.xlu1 %v433_v29 }
 0x2e9   : > { %v435_v30 = vpop.xlane.xlu1 %434 }
 0x2ea   : > { %v436_v31 = vrot.slane %v435_v30, 4 }
 0x2ec   : > { %v437_v32 = vadd.f32 %v436_v31, %v435_v30 }
 0x2ee   : > { %v438_v33 = vrot.slane %v437_v32, 2 }
 0x2f0   : > { %v439_v34 = vadd.f32 %v438_v33, %v437_v32 }
 0x2f2   : > { %v440_v35 = vrot.slane %v439_v34, 1 }
 0x2f4   : > { %v441_v36 = vadd.f32 %v440_v35, %v439_v34 }
 0x2f6   : > { %551 = vpush %v441_v36 }
 0x327   : > { %s552_s7 = spop %551 }
 0x328   : > { %v443_v37 = vstv %s552_s7 }
 0x329   : > { %445 = vst.msk [vmem:[%s230_s6] sm:$0x1] %vm444_vm12, %v443_v37 }
 0x32a PF: > { %s13_s12 = sadd.s32 1, %s587_s12  }
 0x32b   : > { %p10_p5 = scmp.ge.s32.totalorder %s13_s12, 4  }
 0x32d   :  { %12 = sbr.rel (!%p10_p5) target bundleno = 1 (0x1), region = 65 }

// kernel: tpu_custom_call.1
= control target key start
LH: loop header
LB: loop body
LE: loop exit
PB: predicated region body
PF: predicated region fallthrough
CT: control target
= control target key end

     0   :  { %s613_s12 = smov 0   ;;  %s674_s0 = inlined_call_operand.vmem [shape: f32[37,32], index: 0, kind: input, shape index: {}]   ;;  %s675_s1 = inlined_call_operand.vmem [shape: s32[37,1], index: 1, kind: input, shape index: {}]   ;;  %s676_s2 = inlined_call_operand.vmem [shape: f32[32,6], index: 2, kind: input, shape index: {}]   ;;  %s677_s3 = inlined_call_operand.vmem [shape: f32[2,1,1], index: 3, kind: output, shape index: {}]  }
   0x1 LB: > { %s619_s13 = sadd.s32 4294967295, %s587_s12   ;;  %p509_p0 = scmp.ge.s32.totalorder %s587_s12, 1  ;;  %s587_s12 = sphi %s613_s12, %s13_s12  }
   0x2   : > { %p165_p1 = scmp.lt.s32.totalorder %s587_s12, 3 }
   0x4   : > { %p166_p2 = pnand %p509_p0, %p165_p1 }
   0x5   : > { %v234_v0 = vld [vmem:[%s676_s2] sm:$0xff] (!%p166_p2)  ;;  %v235_v1 = vld [vmem:[%s676_s2 + $0x8] sm:$0xff] (!%p166_p2)  ;;  %vm242_vm0 = vcmask (!%p166_p2), 48128   ;;  %v236_v2 = vld [vmem:[%s676_s2 + $0x10] sm:$0xff] (!%p166_p2)  ;;  %v589_v3 = vmov (!%p166_p2), 0.0|0.0   ;;  %s200_s22 = smul.u32 (!%p166_p2), 3, %s619_s13 }
   0x6   : > { %169 = sbr.rel (%p166_p2) target bundleno = 810 (0x32a), region = 32  ;;  %541 = vmatprep.subr.bf16.mxu0 (!%p166_p2), %v589_v3  ;;  %547 = vmatprep.subr.bf16.mxu1 (!%p166_p2), %v589_v3  ;;  %v238_v4 = vmul.f32 (!%p166_p2), %v234_v0, %v234_v0  ;;  %v239_v5 = vmul.f32 (!%p166_p2), %v235_v1, %v235_v1  ;;  %v542_v6 = vpack.c.bf16 (!%p166_p2), %v235_v1, %v234_v0  ;;  %v237_v7 = vld [vmem:[%s676_s2 + $0x18] sm:$0xff] (!%p166_p2)  ;;  %vm590_vm1 = vmmov (!%p166_p2), 0   ;;  %p228_p4 = scmp.lt.s32.totalorder (!%p166_p2), %s619_s13, 1 }
   0x7   : > { %v240_v8 = vmul.f32 (!%p166_p2), %v236_v2, %v236_v2  ;;  %v241_v9 = vmul.f32 (!%p166_p2), %v237_v7, %v237_v7  ;;  %v591_v10 = vmov (!%p166_p2), 0.0   ;;  %v545_v13 = vpack.c.bf16 (!%p166_p2), %v237_v7, %v236_v2  ;;  %p205_p3 = scmp.lt.s32.totalorder (!%p166_p2), %s200_s22, 4  ;;  %s393_s30 = smul.u32 (!%p166_p2), 24, %s619_s13 }
   0x8   : > { %532 = vmatprep.mubr.msk.f32.mxu0 (!%p166_p2), %vm590_vm1, %v591_v10  ;;  %535 = vmatprep.mubr.msk.f32.mxu1 (!%p166_p2), %vm590_vm1, %v591_v10  ;;  %v243_v11 = vsel (!%p166_p2), %vm242_vm0, %v238_v4, 0.0  ;;  %v244_v12 = vsel (!%p166_p2), %vm242_vm0, %v239_v5, 0.0  ;;  %vm259_vm2 = vcmask (!%p166_p2), 261120   ;;  %v592_v43 = vmov (!%p166_p2), 0  }
   0x9   : > { %543 = vmatpush3.bf16.msra.mxu0 (!%p166_p2), %v542_v6  ;;  %549 = vmatpush3.bf16.msra.mxu1 (!%p166_p2), %v542_v6  ;;  %v245_v14 = vadd.f32 (!%p166_p2), %v244_v12, %v243_v11  ;;  %v246_v15 = vsel (!%p166_p2), %vm242_vm0, %v240_v8, 0.0  ;;  %v248_v16 = vsel (!%p166_p2), %vm242_vm0, %v241_v9, 0.0  ;;  %v391_v0 = vlaneseq (!%p166_p2) }
   0xa   : > { %544 = vmatprep.subr.bf16.mxu0 (!%p166_p2), %v589_v3  ;;  %548 = vmatprep.subr.bf16.mxu1 (!%p166_p2), %v589_v3  ;;  %v398_v4 = vstv (!%p166_p2), %s393_s30  ;;  %vm444_vm12 = vcmask (!%p166_p2), 0  }
   0xb   : > { %v247_v17 = vadd.f32 (!%p166_p2), %v246_v15, %v245_v14  ;;  %566 = vset.pattern.permute.xlu1 (!%p166_p2), %v592_v43  ;;  %565 = vset.pattern.permute.xlu0 (!%p166_p2), %v592_v43  ;;  %v395_v1 = vshrl.u32 (!%p166_p2), %v391_v0, 7  ;;  %v392_v8 = vand.u32 (!%p166_p2), 127, %v391_v0 }
   0xd   : > { %s679_s22 = smov (!%p205_p3, %s200_s22), 4  ;;  %546 = vmatpush3.bf16.msra.mxu0 %v545_v13  ;;  %550 = vmatpush3.bf16.msra.mxu1 %v545_v13  ;;  %v249_v18 = vadd.f32 %v248_v16, %v247_v17  ;;  %v396_v3 = vadd.s32 8, %v395_v1  ;;  %v399_v11 = vadd.s32 %v398_v4, %v395_v1  ;;  %v397_v14 = vadd.s32 16, %v395_v1  ;;  %s681_s13 = smov (!%p228_p4, %s619_s13), 1 }
   0xe   : > { %s510_s23 = sshll.u32 %s679_s22, 3  ;;  %s230_s6 = scalar_lea.vmem %s677_s3, %s681_s13 }
   0xf   : > { %s208_s26 = scalar_lea.vmem %s674_s0, %s510_s23  ;;  %v250_v22 = vrot.slane %v249_v18, 4  ;;  %s222_s29 = scalar_lea.vmem %s675_s1, %s510_s23  ;;  %v400_v9 = vadd.s32 %v398_v4, %v396_v3  ;;  %vm402_vm5 = vcmp.lt.s32.totalorder %v399_v11, 37  ;;  %v401_v17 = vadd.s32 %v398_v4, %v397_v14 }
  0x10   : > { %v231_v19 = vld [vmem:[%s208_s26] sm:$0xff]  ;;  %v232_v20 = vld [vmem:[%s208_s26 + $0x8] sm:$0xff]  ;;  %v233_v21 = vld [vmem:[%s208_s26 + $0x10] sm:$0xff] }
  0x11   : > { %533 = vmatmul.mubr.msk.f32.vlgmr.msra.gmra.mrb[0].mxu0 %vm259_vm2, %v231_v19  ;;  %536 = vmatmul.mubr.msk.f32.vlgmr.msra.gmra.mrb[0].mxu1 %vm259_vm2, %v232_v20  ;;  %v251_v23 = vadd.f32 %v250_v22, %v249_v18  ;;  %v389_v54 = vld [vmem:[%s222_s29 + $0x8] sm:$0xff]  ;;  %v388_v55 = vld [vmem:[%s222_s29] sm:$0xff]  ;;  %v390_v61 = vld [vmem:[%s222_s29 + $0x10] sm:$0xff]  ;;  %vm403_vm3 = vcmp.lt.s32.totalorder %v400_v9, 37  ;;  %vm404_vm9 = vcmp.lt.s32.totalorder %v401_v17, 37 }
  0x12   : > { %538 = vmatprep.mubr.msk.f32.mxu1 %vm590_vm1, %v591_v10 }
  0x13   : > { %v252_v24 = vrot.slane %v251_v23, 2 }
  0x15   : > { %539 = vmatmul.mubr.msk.f32.gmra.mrb[2].mxu1 %vm259_vm2, %v233_v21  ;;  %v253_v25 = vadd.f32 %v252_v24, %v251_v23 }
  0x17   : > { %v254_v26 = vrot.slane %v253_v25, 1 }
  0x19   : > { %v255_v27 = vadd.f32 %v254_v26, %v253_v25 }
  0x1b   : > { %v256_v28 = vmax.f32 %v255_v27, 1e-24 }
  0x1d   : > { %567 = vrsqrt.f32 %v256_v28 }
  0x27   : > { %v568_v29 = vpop.eup %567 }
  0x28   : > { %v258_v30 = vmul.f32 14.285714, %v568_v29 }
  0xe4   : > { %v335_v31 = vpop.f32.mrb[0].mxu0  ;;  %v340_v32 = vpop.f32.mrb[0].mxu1 }
  0xe5   : > { %v349_v33 = vmul.f32 %v335_v31, %v258_v30  ;;  %v534_v34 = vpop.f32.mrb[1].mxu0  ;;  %v350_v35 = vmul.f32 %v340_v32, %v258_v30  ;;  %v537_v36 = vpop.f32.mrb[1].mxu1 }
  0xe7   : > { %v352_v37 = vsel %vm242_vm0, %v349_v33, -inf  ;;  %v355_v40 = vsel %vm242_vm0, %v350_v35, -inf }
  0xe8   : > { %v345_v38 = vpop.f32.mrb[2].mxu1  ;;  %353 = vmax.xlane.f32.xlu0 %v352_v37 }
  0xe9   : > { %v351_v39 = vmul.f32 %v345_v38, %v258_v30  ;;  %v540_v41 = vpop.f32.mrb[3].mxu1 }
  0xeb   : > { %v358_v42 = vsel %vm242_vm0, %v351_v39, -inf }
  0xec   : > { %359 = vmax.xlane.f32.xlu1 %v358_v42  ;;  %356 = vmax.xlane.f32.xlu0 %v355_v40 }
 0x175   : > { %v354_v44 = vpop.xlane.xlu0 %353 }
 0x176   : > { %v361_v45 = vsub.f32 %v349_v33, %v354_v44 }
 0x178   : > { %v364_v46 = vmul.f32 1.442695, %v361_v45 }
 0x179   : > { %v357_v47 = vpop.xlane.xlu0 %356  ;;  %v360_v56 = vpop.xlane.xlu1 %359 }
 0x17a   : > { %569 = vpow2.f32 %v364_v46  ;;  %v362_v48 = vsub.f32 %v350_v35, %v357_v47  ;;  %v363_v57 = vsub.f32 %v351_v39, %v360_v56 }
 0x17c   : > { %v366_v49 = vmul.f32 1.442695, %v362_v48  ;;  %v368_v58 = vmul.f32 1.442695, %v363_v57 }
 0x17e   : > { %571 = vpow2.f32 %v366_v49 }
 0x17f   : > { %573 = vpow2.f32 %v368_v58 }
 0x184   : > { %v570_v50 = vpop.eup %569 }
 0x185   : > { %v370_v51 = vsel %vm242_vm0, %v570_v50, 0.0 }
 0x186   : > { %371 = vadd.xlane.f32.xlu1 %v370_v51 }
 0x188   : > { %v572_v52 = vpop.eup %571 }
 0x189   : > { %v373_v53 = vsel %vm242_vm0, %v572_v52, 0.0  ;;  %v574_v59 = vpop.eup %573 }
 0x18a   : > { %374 = vadd.xlane.f32.xlu0 %v373_v53  ;;  %v376_v60 = vsel %vm242_vm0, %v574_v59, 0.0 }
 0x197   : > { %409 = vperm.xlu1 %566, %v389_v54  }
 0x1a0   : > { %406 = vperm.xlu0 %565, %v388_v55  }
 0x1bb   : > { %377 = vadd.xlane.f32.xlu1 %v376_v60 }
 0x1cc   : > { %412 = vperm.xlu1 %566, %v390_v61  }
 0x213   : > { %v372_v63 = vpop.xlane.xlu1 %371 }
 0x217   : > { %v375_v62 = vpop.xlane.xlu0 %374  ;;  %v410_v2 = vpop.permute.xlu1 %409 }
 0x218   : > { %575 = vlog2.f32 %v375_v62  ;;  %vm415_vm4 = vcmp.eq.s32.totalorder %v410_v2, %v392_v8 }
 0x219   : > { %577 = vlog2.f32 %v372_v63  ;;  %vm424_vm7 = vmand %vm403_vm3, %vm415_vm4 }
 0x21f   : > { %v407_v12 = vpop.permute.xlu0 %406 }
 0x220   : > { %vm414_vm6 = vcmp.eq.s32.totalorder %v407_v12, %v392_v8 }
 0x221   : > { %vm423_vm8 = vmand %vm402_vm5, %vm414_vm6 }
 0x222   : > { %v576_v5 = vpop.eup %575 }
 0x223   : > { %v578_v7 = vpop.eup %577  ;;  %v382_v10 = vmul.f32 0.6931472, %v576_v5 }
 0x224   : > { %v380_v13 = vmul.f32 0.6931472, %v578_v7 }
 0x225   : > { %v386_v15 = vsub.f32 %v362_v48, %v382_v10 }
 0x226   : > { %v385_v16 = vsub.f32 %v361_v45, %v380_v13 }
 0x227   : > { %v427_v19 = vsel %vm424_vm7, %v386_v15, 0.0 }
 0x228   : > { %v426_v21 = vsel %vm423_vm8, %v385_v16, 0.0  ;;  %v430_v23 = vsel %vm242_vm0, %v427_v19, 0.0 }
 0x229   : > { %v429_v25 = vsel %vm242_vm0, %v426_v21, 0.0 }
 0x22a   : > { %v431_v27 = vadd.f32 %v430_v23, %v429_v25 }
 0x248   : > { %v378_v6 = vpop.xlane.xlu1 %377 }
 0x249   : > { %579 = vlog2.f32 %v378_v6 }
 0x24c   : > { %v413_v18 = vpop.permute.xlu1 %412 }
 0x24d   : > { %vm416_vm10 = vcmp.eq.s32.totalorder %v413_v18, %v392_v8 }
 0x24e   : > { %vm425_vm11 = vmand %vm404_vm9, %vm416_vm10 }
 0x253   : > { %v580_v20 = vpop.eup %579 }
 0x254   : > { %v384_v22 = vmul.f32 0.6931472, %v580_v20 }
 0x256   : > { %v387_v24 = vsub.f32 %v363_v57, %v384_v22 }
 0x258   : > { %v428_v26 = vsel %vm425_vm11, %v387_v24, 0.0 }
 0x259   : > { %v432_v28 = vsel %vm242_vm0, %v428_v26, 0.0 }
 0x25a   : > { %v433_v29 = vadd.f32 %v432_v28, %v431_v27 }
 0x25c   : > { %434 = vadd.xlane.f32.xlu1 %v433_v29 }
 0x2e9   : > { %v435_v30 = vpop.xlane.xlu1 %434 }
 0x2ea   : > { %v436_v31 = vrot.slane %v435_v30, 4 }
 0x2ec   : > { %v437_v32 = vadd.f32 %v436_v31, %v435_v30 }
 0x2ee   : > { %v438_v33 = vrot.slane %v437_v32, 2 }
 0x2f0   : > { %v439_v34 = vadd.f32 %v438_v33, %v437_v32 }
 0x2f2   : > { %v440_v35 = vrot.slane %v439_v34, 1 }
 0x2f4   : > { %v441_v36 = vadd.f32 %v440_v35, %v439_v34 }
 0x2f6   : > { %551 = vpush %v441_v36 }
 0x327   : > { %s552_s7 = spop %551 }
 0x328   : > { %v443_v37 = vstv %s552_s7 }
 0x329   : > { %445 = vst.msk [vmem:[%s230_s6] sm:$0x1] %vm444_vm12, %v443_v37 }
 0x32a PF: > { %s13_s12 = sadd.s32 1, %s587_s12  }
 0x32b   : > { %p10_p5 = scmp.ge.s32.totalorder %s13_s12, 4  }
 0x32d   :  { %12 = sbr.rel (!%p10_p5) target bundleno = 1 (0x1), region = 65 }

</bundles_post_ra>
